<compile_context>
chip_gen: v5e
topology: v5e:2x2
jax: 0.10.0
libtpu: 0.0.40
codegen_flags: <defaults>
</compile_context>

<pallas_src>
import functools

import jax
import jax.numpy as jnp
import numpy as np
from jax.experimental import pallas as pl
from jax.experimental.pallas import tpu as pltpu


def _round_up(x, m):
    return (x + m - 1) // m * m


def _pad_rows(w, b, mult=8):
    """Zero-pad (OC, C) weight rows / (OC,) bias rows to a multiple of `mult`."""
    oc = w.shape[0]
    pad = (-oc) % mult
    if pad:
        w = jnp.concatenate([w, jnp.zeros((pad, w.shape[1]), w.dtype)], axis=0)
        b = jnp.concatenate([b, jnp.zeros((pad,), b.dtype)], axis=0)
    return w, b, oc + pad


def _head_flat(x, w_fused, b_fused, oc_cls, oc_reg, oc_dir,
               off_reg, off_dir, *, t_hw=4096):
    """x: (B, C, HW).  w_fused: (OC_pad_total, C).  b_fused: (OC_pad_total, 1).

    off_reg / off_dir are the (sublane-aligned) row offsets of the reg / dir
    segments inside the fused weight.
    """
    B, C, HW = x.shape
    oc_pad_total = w_fused.shape[0]

    # Lane tile over the spatial dim; multiple of 128, no bigger than needed.
    t = min(_round_up(t_hw, 128), _round_up(HW, 128))
    n_sp = pl.cdiv(HW, t)              # masked tail handles HW % t != 0
    grid = (n_sp, B)                   # spatial axis first -> megacore shards it

    tile = lambda si, bi: (bi, 0, si)  # x / outputs: tile along spatial
    full = lambda si, bi: (0, 0)       # weights / bias: resident block

    # Exact f32 accumulation for f32 inputs (parity with the PyTorch head);
    # the extra MXU passes are free, the kernel is HBM-bound.
    precision = (jax.lax.Precision.HIGHEST
                 if x.dtype == jnp.float32 else jax.lax.Precision.DEFAULT)

    def kernel(x_ref, w_ref, b_ref, cls_ref, reg_ref, dir_ref):
        # x_ref: (C, t) spatial tile of one batch element (channels on
        # sublanes, spatial on lanes).  Single fused MXU matmul, split
        # in-register at sublane-aligned offsets.
        y = jnp.dot(w_ref[...], x_ref[...],
                    preferred_element_type=jnp.float32,
                    precision=precision) + b_ref[...]
        cls_ref[...] = y[:oc_cls].astype(cls_ref.dtype)
        reg_ref[...] = y[off_reg:off_reg + oc_reg].astype(reg_ref.dtype)
        dir_ref[...] = y[off_dir:off_dir + oc_dir].astype(dir_ref.dtype)

    out_shapes = (
        jax.ShapeDtypeStruct((B, oc_cls, HW), jnp.float32),
        jax.ShapeDtypeStruct((B, oc_reg, HW), jnp.float32),
        jax.ShapeDtypeStruct((B, oc_dir, HW), jnp.float32),
    )

    in_bytes = int(np.prod(x.shape)) * x.dtype.itemsize
    out_bytes = 4 * B * HW * (oc_cls + oc_reg + oc_dir)
    w_bytes = int(np.prod(w_fused.shape)) * w_fused.dtype.itemsize + 4 * oc_pad_total
    cost = pl.CostEstimate(
        flops=2 * B * HW * C * oc_pad_total,
        transcendentals=0,
        bytes_accessed=in_bytes + out_bytes + w_bytes,
    )

    return pl.pallas_call(
        kernel,
        out_shape=out_shapes,
        grid_spec=pltpu.PrefetchScalarGridSpec(
            num_scalar_prefetch=0,
            grid=grid,
            in_specs=[
                pl.BlockSpec((None, C, t), tile),          # x tile (C, t)
                pl.BlockSpec((oc_pad_total, C), full),     # fused weight (resident)
                pl.BlockSpec((oc_pad_total, 1), full),     # fused bias (resident)
            ],
            out_specs=[
                pl.BlockSpec((None, oc_cls, t), tile),
                pl.BlockSpec((None, oc_reg, t), tile),
                pl.BlockSpec((None, oc_dir, t), tile),
            ],
        ),
        compiler_params=pltpu.CompilerParams(
            dimension_semantics=("parallel", "parallel")),
        cost_estimate=cost,
    )(x, w_fused, b_fused)


def head_forward(x_nchw, params, *, t_hw=4096, compute_dtype=jnp.float32):
    """Forward pass matching the head: three 1x1 convs on the same input.

    x_nchw: (B, C_in, H, W) float32
    returns (bbox_cls_pred, bbox_pred, bbox_dir_cls_pred) in NCHW.
    compute_dtype=jnp.bfloat16 halves the dominant HBM read of x (accumulation
    stays f32); off by default pending accuracy sign-off.
    """
    B, C, H, W = x_nchw.shape
    HW = H * W
    oc_cls = params["w_cls"].shape[0]
    oc_reg = params["w_reg"].shape[0]
    oc_dir = params["w_dir"].shape[0]

    # Pad each head's rows to a sublane multiple so the in-register splits of
    # the fused result are sublane-aligned; padded rows are never stored.
    w_cls, b_cls, oc_cls_p = _pad_rows(params["w_cls"], params["b_cls"])
    w_reg, b_reg, oc_reg_p = _pad_rows(params["w_reg"], params["b_reg"])
    w_dir, b_dir, _ = _pad_rows(params["w_dir"], params["b_dir"])
    off_reg = oc_cls_p
    off_dir = oc_cls_p + oc_reg_p

    w_fused = jnp.concatenate([w_cls, w_reg, w_dir], axis=0).astype(compute_dtype)
    b_fused = jnp.concatenate([b_cls, b_reg, b_dir], axis=0)
    b_fused = b_fused.reshape(-1, 1).astype(jnp.float32)

    x_flat = x_nchw.reshape(B, C, HW).astype(compute_dtype)  # NCHW -> free reshape

    cls_f, reg_f, dir_f = _head_flat(
        x_flat, w_fused, b_fused, oc_cls, oc_reg, oc_dir,
        off_reg, off_dir, t_hw=t_hw)

    return (cls_f.reshape(B, oc_cls, H, W),
            reg_f.reshape(B, oc_reg, H, W),
            dir_f.reshape(B, oc_dir, H, W))


def init_head_params(key, in_channel, n_anchors, n_classes):
    """Deterministic init mirroring the head's __init__ (PyTorch layout OCxIC)."""
    oc_cls = n_anchors * n_classes
    oc_reg = n_anchors * 7
    oc_dir = n_anchors * 2
    k1, k2, k3 = jax.random.split(key, 3)
    std = 0.01
    prior_prob = 0.01
    bias_cls_init = float(-np.log((1.0 - prior_prob) / prior_prob))

    return {
        "w_cls": jax.random.normal(k1, (oc_cls, in_channel), jnp.float32) * std,
        "b_cls": jnp.full((oc_cls,), bias_cls_init, jnp.float32),
        "w_reg": jax.random.normal(k2, (oc_reg, in_channel), jnp.float32) * std,
        "b_reg": jnp.zeros((oc_reg,), jnp.float32),
        "w_dir": jax.random.normal(k3, (oc_dir, in_channel), jnp.float32) * std,
        "b_dir": jnp.zeros((oc_dir,), jnp.float32),
    }


def _ref_head(x, params):
    def conv1x1(x, w, b):
        # x: (B, C, H, W), w: (OC, C), b: (OC,) -- exact f32 to match HIGHEST.
        y = jnp.einsum("bchw,oc->bohw", x, w,
                       precision=jax.lax.Precision.HIGHEST)
        return y + b[None, :, None, None]
    return (conv1x1(x, params["w_cls"], params["b_cls"]),
            conv1x1(x, params["w_reg"], params["b_reg"]),
            conv1x1(x, params["w_dir"], params["b_dir"]))


if __name__ == "__main__":
    # Small shapes consistent with the module (real model: (bs, 384, 248, 216)).
    B, C_in, H, W = 2, 32, 16, 16
    n_anchors, n_classes = 2, 3

    key = jax.random.PRNGKey(0)
    kx, kp, kx2 = jax.random.split(key, 3)
    x = jax.random.normal(kx, (B, C_in, H, W), jnp.float32)
    params = init_head_params(kp, C_in, n_anchors, n_classes)

    fwd = jax.jit(functools.partial(head_forward))        # default t_hw=4096 (clamped)
    cls_pred, reg_pred, dir_pred = fwd(x, params)
    jax.block_until_ready((cls_pred, reg_pred, dir_pred))

    assert cls_pred.shape == (B, n_anchors * n_classes, H, W)
    assert reg_pred.shape == (B, n_anchors * 7, H, W)
    assert dir_pred.shape == (B, n_anchors * 2, H, W)

    ref_cls, ref_reg, ref_dir = _ref_head(x, params)
    np.testing.assert_allclose(np.asarray(cls_pred), np.asarray(ref_cls),
                               rtol=1e-4, atol=1e-5)
    np.testing.assert_allclose(np.asarray(reg_pred), np.asarray(ref_reg),
                               rtol=1e-4, atol=1e-5)
    np.testing.assert_allclose(np.asarray(dir_pred), np.asarray(ref_dir),
                               rtol=1e-4, atol=1e-5)

    # Second check: spatial size NOT a multiple of the tile (masked tail path,
    # same situation as the real 248*216 grid).
    H2, W2 = 12, 18                      # HW = 216, not a multiple of 128
    x2 = jax.random.normal(kx2, (B, C_in, H2, W2), jnp.float32)
    fwd2 = jax.jit(functools.partial(head_forward, t_hw=128))
    cls2, reg2, dir2 = fwd2(x2, params)
    jax.block_until_ready((cls2, reg2, dir2))
    ref_cls2, ref_reg2, ref_dir2 = _ref_head(x2, params)
    np.testing.assert_allclose(np.asarray(cls2), np.asarray(ref_cls2),
                               rtol=1e-4, atol=1e-5)
    np.testing.assert_allclose(np.asarray(reg2), np.asarray(ref_reg2),
                               rtol=1e-4, atol=1e-5)
    np.testing.assert_allclose(np.asarray(dir2), np.asarray(ref_dir2),
                               rtol=1e-4, atol=1e-5)

    print("KERNEL_OK")
</pallas_src>

<mosaic_0001>
module attributes {stable_mosaic.version = 11 : i64} {
  func.func @kernel(%arg0: i32, %arg1: i32, %arg2: memref<1x32x256xf32, #tpu.memory_space<vmem>>, %arg3: memref<32x32xf32, #tpu.memory_space<vmem>>, %arg4: memref<32x1xf32, #tpu.memory_space<vmem>>, %arg5: memref<1x6x256xf32, #tpu.memory_space<vmem>>, %arg6: memref<1x14x256xf32, #tpu.memory_space<vmem>>, %arg7: memref<1x4x256xf32, #tpu.memory_space<vmem>>) attributes {dimension_semantics = [#tpu.dimension_semantics<parallel>, #tpu.dimension_semantics<parallel>], iteration_bounds = array<i64: 1, 2>, scalar_prefetch = 0 : i64, scratch_operands = 0 : i64, tpu.core_type = #tpu.core_type<tc>, window_params = [{transform_indices = @transform_0, window_bounds = array<i64: 1, 32, 256>}, {pipeline_mode = #tpu.pipeline_mode<synchronous>, transform_indices = @transform_1, window_bounds = array<i64: 32, 32>}, {pipeline_mode = #tpu.pipeline_mode<synchronous>, transform_indices = @transform_2, window_bounds = array<i64: 32, 1>}, {transform_indices = @transform_3, window_bounds = array<i64: 1, 6, 256>}, {transform_indices = @transform_4, window_bounds = array<i64: 1, 14, 256>}, {transform_indices = @transform_5, window_bounds = array<i64: 1, 4, 256>}]} {
    %c0 = arith.constant 0 : index
    %c0_0 = arith.constant 0 : index
    %0 = vector.load %arg3[%c0, %c0_0] : memref<32x32xf32, #tpu.memory_space<vmem>>, vector<32x32xf32>
    %c0_1 = arith.constant 0 : index
    %c0_2 = arith.constant 0 : index
    %c0_3 = arith.constant 0 : index
    %1 = vector.load %arg2[%c0_1, %c0_2, %c0_3] : memref<1x32x256xf32, #tpu.memory_space<vmem>>, vector<1x32x256xf32>
    %2 = vector.shape_cast %1 : vector<1x32x256xf32> to vector<32x256xf32>
    %cst = arith.constant dense<0.000000e+00> : vector<32x256xf32>
    %3 = tpu.matmul %0, %2, %cst {dimension_numbers = #tpu.dot_dimension_numbers<[1], [0], [0], [1], [0, 0, 1, 1], [], []>, precision = #tpu.contract_precision<fp32>} : vector<32x32xf32>, vector<32x256xf32>, vector<32x256xf32> -> vector<32x256xf32>
    %c0_4 = arith.constant 0 : index
    %c0_5 = arith.constant 0 : index
    %4 = vector.load %arg4[%c0_4, %c0_5] : memref<32x1xf32, #tpu.memory_space<vmem>>, vector<32x1xf32>
    %5 = vector.broadcast %4 : vector<32x1xf32> to vector<32x256xf32>
    %6 = arith.addf %3, %5 : vector<32x256xf32>
    %7 = vector.extract_strided_slice %6 {offsets = [0, 0], sizes = [6, 256], strides = [1, 1]} : vector<32x256xf32> to vector<6x256xf32>
    %c0_6 = arith.constant 0 : index
    %c0_7 = arith.constant 0 : index
    %c0_8 = arith.constant 0 : index
    %8 = vector.load %arg5[%c0_6, %c0_7, %c0_8] : memref<1x6x256xf32, #tpu.memory_space<vmem>>, vector<1x6x256xf32>
    %9 = vector.shape_cast %8 : vector<1x6x256xf32> to vector<6x256xf32>
    %10 = vector.shape_cast %7 : vector<6x256xf32> to vector<1x6x256xf32>
    tpu.vector_store %arg5[%c0_6, %c0_7, %c0_8], %10 {strides = array<i32>} : memref<1x6x256xf32, #tpu.memory_space<vmem>>, vector<1x6x256xf32>,
    %11 = vector.extract_strided_slice %6 {offsets = [8, 0], sizes = [14, 256], strides = [1, 1]} : vector<32x256xf32> to vector<14x256xf32>
    %c0_9 = arith.constant 0 : index
    %c0_10 = arith.constant 0 : index
    %c0_11 = arith.constant 0 : index
    %12 = vector.load %arg6[%c0_9, %c0_10, %c0_11] : memref<1x14x256xf32, #tpu.memory_space<vmem>>, vector<1x14x256xf32>
    %13 = vector.shape_cast %12 : vector<1x14x256xf32> to vector<14x256xf32>
    %14 = vector.shape_cast %11 : vector<14x256xf32> to vector<1x14x256xf32>
    tpu.vector_store %arg6[%c0_9, %c0_10, %c0_11], %14 {strides = array<i32>} : memref<1x14x256xf32, #tpu.memory_space<vmem>>, vector<1x14x256xf32>,
    %15 = vector.extract_strided_slice %6 {offsets = [24, 0], sizes = [4, 256], strides = [1, 1]} : vector<32x256xf32> to vector<4x256xf32>
    %c0_12 = arith.constant 0 : index
    %c0_13 = arith.constant 0 : index
    %c0_14 = arith.constant 0 : index
    %16 = vector.load %arg7[%c0_12, %c0_13, %c0_14] : memref<1x4x256xf32, #tpu.memory_space<vmem>>, vector<1x4x256xf32>
    %17 = vector.shape_cast %16 : vector<1x4x256xf32> to vector<4x256xf32>
    %18 = vector.shape_cast %15 : vector<4x256xf32> to vector<1x4x256xf32>
    tpu.vector_store %arg7[%c0_12, %c0_13, %c0_14], %18 {strides = array<i32>} : memref<1x4x256xf32, #tpu.memory_space<vmem>>, vector<1x4x256xf32>,
    return
  }
  func.func @transform_0(%arg0: i32, %arg1: i32) -> (i32, i32, i32) {
    %c0_i32 = arith.constant 0 : i32
    %c0_i32_0 = arith.constant 0 : i32
    return %arg1, %c0_i32, %arg0 : i32, i32, i32
  }
  func.func @transform_1(%arg0: i32, %arg1: i32) -> (i32, i32) {
    %c0_i32 = arith.constant 0 : i32
    %c0_i32_0 = arith.constant 0 : i32
    %c0_i32_1 = arith.constant 0 : i32
    return %c0_i32, %c0_i32_0 : i32, i32
  }
  func.func @transform_2(%arg0: i32, %arg1: i32) -> (i32, i32) {
    %c0_i32 = arith.constant 0 : i32
    %c0_i32_0 = arith.constant 0 : i32
    %c0_i32_1 = arith.constant 0 : i32
    return %c0_i32, %c0_i32_0 : i32, i32
  }
  func.func @transform_3(%arg0: i32, %arg1: i32) -> (i32, i32, i32) {
    %c0_i32 = arith.constant 0 : i32
    %c0_i32_0 = arith.constant 0 : i32
    return %arg1, %c0_i32, %arg0 : i32, i32, i32
  }
  func.func @transform_4(%arg0: i32, %arg1: i32) -> (i32, i32, i32) {
    %c0_i32 = arith.constant 0 : i32
    %c0_i32_0 = arith.constant 0 : i32
    return %arg1, %c0_i32, %arg0 : i32, i32, i32
  }
  func.func @transform_5(%arg0: i32, %arg1: i32) -> (i32, i32, i32) {
    %c0_i32 = arith.constant 0 : i32
    %c0_i32_0 = arith.constant 0 : i32
    return %arg1, %c0_i32, %arg0 : i32, i32, i32
  }
}

</mosaic_0001>

<bundles_post_ra>
// kernel: head_forward.1
= control target key start
LH: loop header
LB: loop body
LE: loop exit
PB: predicated region body
PF: predicated region fallthrough
CT: control target
= control target key end

     0   :  { %s1217_s18 = smov 0   ;;  %s1219_s19 = smov 0   ;;  %s1504_s0 = inlined_call_operand.vmem [shape: f32[2,32,256], index: 0, kind: input, shape index: {}]   ;;  %s1505_s1 = inlined_call_operand.vmem [shape: f32[32,32], index: 1, kind: input, shape index: {}]   ;;  %s1506_s2 = inlined_call_operand.vmem [shape: f32[32,1], index: 2, kind: input, shape index: {}]   ;;  %s1507_s3 = inlined_call_operand.vmem [shape: f32[2,6,256], index: 3, kind: output, shape index: {0}]   ;;  %s1508_s4 = inlined_call_operand.vmem [shape: f32[2,14,256], index: 4, kind: output, shape index: {1}]   ;;  %s1509_s5 = inlined_call_operand.vmem [shape: f32[2,4,256], index: 5, kind: output, shape index: {2}]  }
   0x1   :  { %s1221_s20 = smov 0  }
   0x2 LB: > { %s25_s21 = sadd.s32 1, %s1180_s19  ;;  %p1120_p0 = scmp.ge.s32.totalorder %s1184_s20, 1  ;;  %s1184_s20 = sphi %s1221_s20, %s16_s20   ;;  %s1180_s19 = sphi %s1219_s19, %s1511_s19   ;;  %s1176_s18 = sphi %s1217_s18, %s1510_s18  }
   0x3   : > { %p26_p1 = scmp.ge.s32.totalorder %s25_s21, 2  ;;  %p217_p2 = scmp.lt.s32.totalorder %s1184_s20, 3 }
   0x5   : > { %s1513_s21 = smov (%p26_p1, %s25_s21), 0  ;;  %p218_p3 = pnand %p1120_p0, %p217_p2 }
   0x6   : > { %p272_p4 = scmp.lt.s32.totalorder (!%p218_p3), %s1176_s18, 1 }
   0x7   : > { %221 = sbr.rel (%p218_p3) target bundleno = 258 (0x102), region = 32 }
   0xc   : > { %v311_v0 = vld [vmem:[%s1505_s1] sm:$0xff]  ;;  %vm347_vm0 = vcmask 261120   ;;  %v312_v1 = vld [vmem:[%s1505_s1 + $0x8] sm:$0xff]  ;;  %v326_v2 = vld [vmem:[%s1506_s2 + $0x18] sm:$0xff]  ;;  %v1186_v4 = vmov 0   ;;  %s1515_s18 = smov (!%p272_p4, %s1176_s18), 1 }
   0xd   : > { %v349_v3 = vsel %vm347_vm0, %v311_v0, 0  ;;  %1160 = vset.pattern.permute.xlu0 %v1186_v4  ;;  %v352_v5 = vsel %vm347_vm0, %v312_v1, 0  ;;  %1161 = vset.pattern.permute.xlu1 %v1186_v4  ;;  %v313_v8 = vld [vmem:[%s1505_s1 + $0x10] sm:$0xff]  ;;  %s1131_s30 = sshll.u32 %s1515_s18, 6  ;;  %v323_v10 = vld [vmem:[%s1506_s2] sm:$0xff]  ;;  %v324_v26 = vld [vmem:[%s1506_s2 + $0x8] sm:$0xff] }
   0xe   : > { %v1248_v6 = vand.u32 4294901760, %v349_v3  ;;  %v1250_v7 = vand.u32 4294901760, %v352_v5  ;;  %344 = vperm.xlu0 %1160, %v326_v2   ;;  %s1262_s8 = scalar_lea.vmem %s1504_s0, %s1131_s30  ;;  %v355_v16 = vsel %vm347_vm0, %v313_v8, 0  ;;  %334 = vperm.xlu1 %1161, %v324_v26   ;;  %v314_v50 = vld [vmem:[%s1505_s1 + $0x18] sm:$0xff]  ;;  %s1132_s17 = sshll.u32 %s1515_s18, 4  ;;  %vm925_vm1 = vcmask 1043456  }
   0xf   : > { %v321_v11 = vld [vmem:[%s1262_s8 + $0x30] sm:$0xff]  ;;  %v319_v12 = vld [vmem:[%s1262_s8 + $0x20] sm:$0xff]  ;;  %v322_v21 = vld [vmem:[%s1262_s8 + $0x38] sm:$0xff]  ;;  %v1316_v35 = vand.u32 4294901760, %v355_v16  ;;  %v358_v61 = vsel %vm347_vm0, %v314_v50, 0  ;;  %s1471_s24 = scalar_lea.vmem %s1507_s3, %s1132_s17  ;;  %s1133_s25 = sshll.u32 %s1515_s18, 5 }
  0x10   : > { %v1257_v9 = vsub.f32 %v349_v3, %v1248_v6  ;;  %v317_v13 = vld [vmem:[%s1262_s8 + $0x10] sm:$0xff]  ;;  %v1274_v15 = vsub.f32 %v352_v5, %v1250_v7  ;;  %v1277_v17 = vand.u32 4294901760, %v321_v11  ;;  %v1279_v18 = vand.u32 4294901760, %v319_v12  ;;  %v315_v20 = vld [vmem:[%s1262_s8] sm:$0xff]  ;;  %v320_v22 = vld [vmem:[%s1262_s8 + $0x28] sm:$0xff]  ;;  %s1478_s28 = scalar_lea.vmem %s1508_s4, %s1133_s25  ;;  %s1134_s29 = sshll.u32 %s1515_s18, 3 }
  0x11   : > { %v1281_v19 = vand.u32 4294901760, %v317_v13  ;;  %v1286_v23 = vand.u32 4294901760, %v315_v20  ;;  %v1290_v25 = vand.u32 4294901760, %v322_v21  ;;  %v1304_v30 = vand.u32 4294901760, %v320_v22  ;;  %v318_v31 = vld [vmem:[%s1262_s8 + $0x18] sm:$0xff]  ;;  %v316_v51 = vld [vmem:[%s1262_s8 + $0x8] sm:$0xff]  ;;  %s309_s7 = scalar_lea.vmem %s1509_s5, %s1134_s29 }
  0x12   : > { %v1271_v14 = vand.u32 4294901760, %v1257_v9  ;;  %373 = vmatpush.msra.mxu0 %v1277_v17  ;;  %v426_v27 = vsub.f32 %v321_v11, %v1277_v17  ;;  %v1298_v28 = vsub.f32 %v319_v12, %v1279_v18  ;;  %524 = vmatpush.msra.mxu3 %v1277_v17  ;;  %v1314_v34 = vand.u32 4294901760, %v1274_v15 }
  0x13   : > { %v1302_v29 = vsub.f32 %v317_v13, %v1281_v19  ;;  %v1308_v32 = vsub.f32 %v315_v20, %v1286_v23  ;;  %v1311_v33 = vsub.f32 %v322_v21, %v1290_v25  ;;  %v1322_v39 = vsub.f32 %v320_v22, %v1304_v30  ;;  %v325_v20 = vld [vmem:[%s1506_s2 + $0x10] sm:$0xff] }
  0x14   : > { %v383_v24 = vsub.f32 %v1257_v9, %v1271_v14  ;;  %375 = vmatpush.msra.mxu0 %v1279_v18  ;;  %480 = vmatpush.msra.mxu2 %v426_v27  ;;  %v427_v36 = vand.u32 4294901760, %v426_v27  ;;  %v433_v37 = vand.u32 4294901760, %v1298_v28  ;;  %v1329_v43 = vand.u32 4294901760, %v318_v31 }
  0x15   : > { %v439_v38 = vand.u32 4294901760, %v1302_v29  ;;  %526 = vmatpush.msra.mxu3 %v1279_v18  ;;  %v705_v41 = vand.u32 4294901760, %v1311_v33  ;;  %v445_v42 = vand.u32 4294901760, %v1308_v32  ;;  %v711_v47 = vand.u32 4294901760, %v1322_v39 }
  0x16   : > { %329 = vperm.xlu0 %1160, %v323_v10   ;;  %v1324_v40 = vand.u32 4294901760, %v383_v24  ;;  %377 = vmatpush.msra.mxu0 %v1281_v19  ;;  %v428_v44 = vsub.f32 %v426_v27, %v427_v36  ;;  %v434_v45 = vsub.f32 %v1298_v28, %v433_v37  ;;  %v1341_v49 = vsub.f32 %v318_v31, %v1329_v43 }
  0x17   : > { %483 = vmatpush.msra.mxu2 %v1298_v28  ;;  %v440_v46 = vsub.f32 %v1302_v29, %v439_v38  ;;  %528 = vmatpush.msra.mxu3 %v1281_v19  ;;  %v706_v48 = vsub.f32 %v1311_v33, %v705_v41  ;;  %v446_v54 = vsub.f32 %v1308_v32, %v445_v42  ;;  %v1365_v62 = vand.u32 4294901760, %v316_v51 }
  0x18   : > { %379 = vmatpush.msra.mxu0 %v1286_v23  ;;  %v429_v52 = vand.u32 4294901760, %v428_v44  ;;  %v435_v53 = vand.u32 4294901760, %v434_v45  ;;  %v712_v55 = vsub.f32 %v1322_v39, %v711_v47  ;;  %v391_v57 = vsub.f32 %v1274_v15, %v1314_v34  ;;  %339 = vperm.xlu1 %1161, %v325_v20  }
  0x19   : > { %486 = vmatpush.msra.mxu2 %v1302_v29  ;;  %385 = vmatmul.f32.vlgmr.msra.gmra.mxu0 %v1324_v40  ;;  %v707_v56 = vand.u32 4294901760, %v706_v48  ;;  %v1360_v58 = vsub.f32 %v355_v16, %v1316_v35  ;;  %v717_v59 = vand.u32 4294901760, %v1341_v49  ;;  %v441_v60 = vand.u32 4294901760, %v440_v46 }
  0x1a   : > { %530 = vmatpush.msra.mxu3 %v1286_v23  ;;  %430 = vmatpush.msra.mxu1 %v429_v52  ;;  %v713_v63 = vand.u32 4294901760, %v712_v55  ;;  %v447_v0 = vand.u32 4294901760, %v446_v54  ;;  %v722_v2 = vsub.f32 %v316_v51, %v1365_v62  ;;  %v1372_v3 = vand.u32 4294901760, %v391_v57 }
  0x1b   : > { %489 = vmatpush.msra.mxu2 %v1308_v32  ;;  %534 = vmatmul.f32.vlgmr.msra.gmra.mxu3 %v1271_v14  ;;  %v718_v1 = vsub.f32 %v1341_v49, %v717_v59  ;;  %v1375_v4 = vand.u32 4294901760, %v1360_v58  ;;  %v1377_v5 = vand.u32 4294901760, %v358_v61 }
  0x1c   : > { %492 = vmatmul.f32.vlgmr.msra.gmra.mxu2 %v1257_v9  ;;  %436 = vmatpush.msra.mxu1 %v435_v53  ;;  %v723_v8 = vand.u32 4294901760, %v722_v2 }
  0x1d   : > { %651 = vmatpush.msrb.mxu2 %v1290_v25  ;;  %571 = vmatpush.msrb.mxu0 %v427_v36  ;;  %v719_v10 = vand.u32 4294901760, %v718_v1  ;;  %v399_v12 = vsub.f32 %v1360_v58, %v1375_v4  ;;  %v1386_v13 = vsub.f32 %v358_v61, %v1377_v5 }
  0x1e   : > { %708 = vmatpush.msrb.mxu3 %v707_v56  ;;  %442 = vmatpush.msra.mxu1 %v441_v60  ;;  %v724_v11 = vsub.f32 %v722_v2, %v723_v8 }
  0x1f   : > { %653 = vmatpush.msrb.mxu2 %v1304_v30  ;;  %575 = vmatpush.msrb.mxu0 %v433_v37  ;;  %v400_v21 = vand.u32 4294901760, %v399_v12  ;;  %v1396_v22 = vand.u32 4294901760, %v1386_v13 }
  0x20   : > { %714 = vmatpush.msrb.mxu3 %v713_v63  ;;  %448 = vmatpush.msra.mxu1 %v447_v0  ;;  %v725_v16 = vand.u32 4294901760, %v724_v11 }
  0x21   : > { %655 = vmatpush.msrb.mxu2 %v1329_v43  ;;  %393 = vmatmul.f32.gmra.mxu0 %v1372_v3 }
  0x22   : > { %450 = vmatmul.f32.vlgmr.msra.gmra.mxu1 %v1248_v6  ;;  %579 = vmatpush.msrb.mxu0 %v439_v38 }
  0x23   : > { %614 = vmatpush.msrb.mxu1 %v1277_v17  ;;  %540 = vmatmul.f32.gmra.mxu3 %v1314_v34  ;;  %v407_v17 = vsub.f32 %v1386_v13, %v1396_v22 }
  0x24   : > { %497 = vmatmul.f32.gmra.mxu2 %v1274_v15  ;;  %720 = vmatpush.msrb.mxu3 %v719_v10 }
  0x25   : > { %616 = vmatpush.msrb.mxu1 %v1279_v18  ;;  %657 = vmatpush.msrb.mxu2 %v1365_v62  ;;  %v408_v18 = vand.u32 4294901760, %v407_v17 }
  0x26   : > { %583 = vmatpush.msrb.mxu0 %v445_v42  ;;  %726 = vmatpush.msrb.mxu3 %v725_v16 }
  0x27   : > { %618 = vmatpush.msrb.mxu1 %v1281_v19  ;;  %849 = vmatpush.msra.mxu2 %v705_v41 }
  0x28   : > { %758 = vmatpush.msra.mxu0 %v1311_v33  ;;  %892 = vmatpush.msra.mxu3 %v1290_v25 }
  0x29   : > { %620 = vmatpush.msrb.mxu1 %v1286_v23  ;;  %401 = vmatmul.f32.gmra.mxu0 %v400_v21 }
  0x2a   : > { %454 = vmatmul.f32.gmra.mxu1 %v1250_v7  ;;  %853 = vmatpush.msra.mxu2 %v711_v47 }
  0x2b   : > { %802 = vmatpush.msra.mxu1 %v1290_v25  ;;  %546 = vmatmul.f32.gmra.mxu3 %v1375_v4 }
  0x2c   : > { %502 = vmatmul.f32.gmra.mxu2 %v1360_v58  ;;  %761 = vmatpush.msra.mxu0 %v1322_v39 }
  0x2d   : > { %894 = vmatpush.msra.mxu3 %v1304_v30  ;;  %804 = vmatpush.msra.mxu1 %v1304_v30 }
  0x2e   : > { %857 = vmatpush.msra.mxu2 %v717_v59  ;;  %764 = vmatpush.msra.mxu0 %v1341_v49 }
  0x2f   : > { %896 = vmatpush.msra.mxu3 %v1329_v43  ;;  %806 = vmatpush.msra.mxu1 %v1329_v43 }
  0x30   : > { %861 = vmatpush.msra.mxu2 %v723_v8  ;;  %767 = vmatpush.msra.mxu0 %v722_v2 }
  0x31   : > { %409 = vmatmul.f32.gmra.mxu0 %v408_v18  ;;  %898 = vmatpush.msra.mxu3 %v1365_v62 }
  0x32   : > { %458 = vmatmul.f32.gmra.mxu1 %v1316_v35 }
  0x33   : > { %808 = vmatpush.msra.mxu1 %v1365_v62  ;;  %552 = vmatmul.f32.gmra.mxu3 %v1396_v22 }
  0x34   : > { %507 = vmatmul.f32.gmra.mxu2 %v1386_v13 }
  0x39   : > { %585 = vmatmul.f32.vlgmr.msrb.gmra.mxu0 %v1248_v6 }
  0x3a   : > { %462 = vmatmul.f32.gmra.mxu1 %v1377_v5 }
  0x3b   : > { %728 = vmatmul.f32.vlgmr.msrb.gmra.mxu3 %v1248_v6 }
  0x3c   : > { %663 = vmatmul.f32.vlgmr.msrb.gmra.mxu2 %v1324_v40 }
  0x41   : > { %589 = vmatmul.f32.gmra.mxu0 %v1250_v7 }
  0x42   : > { %622 = vmatmul.f32.vlgmr.msrb.gmra.mxu1 %v1248_v6 }
  0x43   : > { %732 = vmatmul.f32.gmra.mxu3 %v1250_v7 }
  0x44   : > { %671 = vmatmul.f32.gmra.mxu2 %v1372_v3 }
  0x49   : > { %593 = vmatmul.f32.gmra.mxu0 %v1316_v35 }
  0x4a   : > { %626 = vmatmul.f32.gmra.mxu1 %v1250_v7 }
  0x4b   : > { %736 = vmatmul.f32.gmra.mxu3 %v1316_v35 }
  0x4c   : > { %679 = vmatmul.f32.gmra.mxu2 %v400_v21 }
  0x51   : > { %597 = vmatmul.f32.gmra.mxu0 %v1377_v5 }
  0x52   : > { %630 = vmatmul.f32.gmra.mxu1 %v1316_v35 }
  0x53   : > { %740 = vmatmul.f32.gmra.mxu3 %v1377_v5 }
  0x54   : > { %687 = vmatmul.f32.gmra.mxu2 %v408_v18 }
  0x59   : > { %770 = vmatmul.f32.vlgmr.msra.gmra.mxu0 %v1257_v9 }
  0x5a   : > { %634 = vmatmul.f32.gmra.mxu1 %v1377_v5 }
  0x5b   : > { %900 = vmatmul.f32.vlgmr.msra.gmra.mxu3 %v1248_v6 }
  0x5c   : > { %863 = vmatmul.f32.vlgmr.msra.gmra.mxu2 %v1248_v6 }
  0x61   : > { %775 = vmatmul.f32.gmra.mxu0 %v1274_v15 }
  0x62   : > { %812 = vmatmul.f32.vlgmr.msra.gmra.mxu1 %v1271_v14 }
  0x63   : > { %904 = vmatmul.f32.gmra.mxu3 %v1250_v7 }
  0x64   : > { %867 = vmatmul.f32.gmra.mxu2 %v1250_v7 }
  0x69   : > { %780 = vmatmul.f32.gmra.mxu0 %v1360_v58 }
  0x6a   : > { %818 = vmatmul.f32.gmra.mxu1 %v1314_v34 }
  0x6b   : > { %908 = vmatmul.f32.gmra.mxu3 %v1316_v35 }
  0x6c   : > { %871 = vmatmul.f32.gmra.mxu2 %v1316_v35 }
  0x71   : > { %785 = vmatmul.f32.gmra.mxu0 %v1386_v13 }
  0x72   : > { %824 = vmatmul.f32.gmra.mxu1 %v1375_v4 }
  0x73   : > { %912 = vmatmul.f32.gmra.mxu3 %v1377_v5 }
  0x74   : > { %875 = vmatmul.f32.gmra.mxu2 %v1377_v5 }
  0x7a   : > { %830 = vmatmul.f32.gmra.mxu1 %v1396_v22 }
  0x80   : > { %v1457_v19 = vpop.permute.xlu0 %344  ;;  %v335_v33 = vpop.permute.xlu1 %334 }
  0x88   : > { %v330_v27 = vpop.permute.xlu0 %329 }
  0x8a   : > { %v340_v43 = vpop.permute.xlu1 %339 }
  0x96   : > { %v386_v6 = vpop.f32.mrf.mxu0 }
  0x97   : > { %v387_v30 = vadd.f32 %v386_v6, %v330_v27 }
  0x9e   : > { %v394_v7 = vpop.f32.mrf.mxu0  ;;  %v535_v15 = vpop.f32.mrf.mxu3 }
  0x9f   : > { %v451_v9 = vpop.f32.mrf.mxu1  ;;  %v493_v14 = vpop.f32.mrf.mxu2  ;;  %v395_v38 = vadd.f32 %v394_v7, %v335_v33 }
  0xa0   : > { %v452_v34 = vadd.f32 %v451_v9, %v387_v30 }
  0xa2   : > { %v494_v37 = vadd.f32 %v493_v14, %v452_v34 }
  0xa4   : > { %v536_v41 = vadd.f32 %v535_v15, %v494_v37 }
  0xa6   : > { %v402_v23 = vpop.f32.mrf.mxu0  ;;  %v541_v26 = vpop.f32.mrf.mxu3 }
  0xa7   : > { %v455_v24 = vpop.f32.mrf.mxu1  ;;  %v498_v25 = vpop.f32.mrf.mxu2  ;;  %v403_v48 = vadd.f32 %v402_v23, %v340_v43 }
  0xa8   : > { %v456_v42 = vadd.f32 %v455_v24, %v395_v38 }
  0xaa   : > { %v499_v47 = vadd.f32 %v498_v25, %v456_v42 }
  0xac   : > { %v542_v52 = vadd.f32 %v541_v26, %v499_v47 }
  0xae   : > { %v1459_v28 = vpop.f32.mrf.mxu0  ;;  %v547_v32 = vpop.f32.mrf.mxu3 }
  0xaf   : > { %v459_v29 = vpop.f32.mrf.mxu1  ;;  %v503_v31 = vpop.f32.mrf.mxu2 }
  0xb0   : > { %v460_v53 = vadd.f32 %v459_v29, %v403_v48 }
  0xb2   : > { %v504_v57 = vadd.f32 %v503_v31, %v460_v53 }
  0xb4   : > { %v548_v61 = vadd.f32 %v547_v32, %v504_v57  ;;  %v411_v32 = vadd.f32 %v1459_v28, %v1457_v19 }
  0xb6   : > { %v586_v36 = vpop.f32.mrf.mxu0  ;;  %v1465_v40 = vpop.f32.mrf.mxu3 }
  0xb7   : > { %v1461_v35 = vpop.f32.mrf.mxu1  ;;  %v1463_v39 = vpop.f32.mrf.mxu2  ;;  %v587_v44 = vadd.f32 %v586_v36, %v536_v41 }
  0xb8   : > { %v464_v42 = vadd.f32 %v1461_v35, %v411_v32 }
  0xba   : > { %v509_v47 = vadd.f32 %v1463_v39, %v464_v42 }
  0xbe   : > { %v590_v45 = vpop.f32.mrf.mxu0  ;;  %v729_v51 = vpop.f32.mrf.mxu3 }
  0xbf   : > { %v623_v46 = vpop.f32.mrf.mxu1  ;;  %v664_v50 = vpop.f32.mrf.mxu2  ;;  %v591_v54 = vadd.f32 %v590_v45, %v542_v52 }
  0xc0   : > { %v624_v49 = vadd.f32 %v623_v46, %v587_v44  ;;  %v665_v8 = vadd.f32 %v664_v50, %v330_v27 }
  0xc2   : > { %916 = vst [vmem:[%s1471_s24] sm:$0x3f] %v624_v49  ;;  %v730_v12 = vadd.f32 %v729_v51, %v665_v8 }
  0xc6   : > { %v594_v55 = vpop.f32.mrf.mxu0  ;;  %v733_v60 = vpop.f32.mrf.mxu3 }
  0xc7   : > { %v627_v56 = vpop.f32.mrf.mxu1  ;;  %v672_v59 = vpop.f32.mrf.mxu2  ;;  %v595_v62 = vadd.f32 %v594_v55, %v548_v61 }
  0xc8   : > { %v628_v58 = vadd.f32 %v627_v56, %v591_v54  ;;  %v673_v21 = vadd.f32 %v672_v59, %v335_v33 }
  0xca   : > { %918 = vst [vmem:[%s1478_s28] sm:$0xff] %v628_v58  ;;  %v734_v7 = vadd.f32 %v733_v60, %v673_v21 }
  0xce   : > { %v598_v63 = vpop.f32.mrf.mxu0  ;;  %v737_v3 = vpop.f32.mrf.mxu3 }
  0xcf   : > { %v631_v0 = vpop.f32.mrf.mxu1  ;;  %v680_v2 = vpop.f32.mrf.mxu2 }
  0xd0   : > { %v632_v1 = vadd.f32 %v631_v0, %v595_v62  ;;  %v681_v23 = vadd.f32 %v680_v2, %v340_v43 }
  0xd2   : > { %920 = vst [vmem:[%s1478_s28 + $0x10] sm:$0x3f] %v632_v1  ;;  %v738_v30 = vadd.f32 %v737_v3, %v681_v23 }
  0xd6   : > { %v771_v5 = vpop.f32.mrf.mxu0  ;;  %v741_v11 = vpop.f32.mrf.mxu3 }
  0xd7   : > { %v635_v4 = vpop.f32.mrf.mxu1  ;;  %v688_v10 = vpop.f32.mrf.mxu2  ;;  %v772_v13 = vadd.f32 %v771_v5, %v730_v12 }
  0xd8   : > { %v689_v36 = vadd.f32 %v688_v10, %v1457_v19  ;;  %v554_v19 = vadd.f32 %v1465_v40, %v509_v47 }
  0xda   : > { %v742_v45 = vadd.f32 %v741_v11, %v689_v36  ;;  %v599_v53 = vadd.f32 %v598_v63, %v554_v19 }
  0xdc   : > { %v636_v35 = vadd.f32 %v635_v4, %v599_v53 }
  0xde   : > { %v776_v16 = vpop.f32.mrf.mxu0  ;;  %v901_v18 = vpop.f32.mrf.mxu3 }
  0xdf   : > { %v813_v20 = vpop.f32.mrf.mxu1  ;;  %v864_v17 = vpop.f32.mrf.mxu2  ;;  %v777_v14 = vadd.f32 %v776_v16, %v734_v7 }
  0xe0   : > { %v814_v22 = vadd.f32 %v813_v20, %v772_v13 }
  0xe2   : > { %v865_v6 = vadd.f32 %v864_v17, %v814_v22 }
  0xe4   : > { %v902_v9 = vadd.f32 %v901_v18, %v865_v6 }
  0xe6   : > { %917 = vst [vmem:[%s1471_s24 + $0x8] sm:$0x3f] %v902_v9  ;;  %v905_v26 = vpop.f32.mrf.mxu3  ;;  %v781_v27 = vpop.f32.mrf.mxu0 }
  0xe7   : > { %v819_v15 = vpop.f32.mrf.mxu1  ;;  %v868_v25 = vpop.f32.mrf.mxu2  ;;  %v782_v33 = vadd.f32 %v781_v27, %v738_v30 }
  0xe8   : > { %v820_v24 = vadd.f32 %v819_v15, %v777_v14 }
  0xea   : > { %v869_v29 = vadd.f32 %v868_v25, %v820_v24 }
  0xec   : > { %v906_v31 = vadd.f32 %v905_v26, %v869_v29 }
  0xee   : > { %919 = vst [vmem:[%s1478_s28 + $0x8] sm:$0xff] %v906_v31  ;;  %v909_v41 = vpop.f32.mrf.mxu3  ;;  %v786_v44 = vpop.f32.mrf.mxu0 }
  0xef   : > { %v825_v34 = vpop.f32.mrf.mxu1  ;;  %v872_v38 = vpop.f32.mrf.mxu2  ;;  %v787_v48 = vadd.f32 %v786_v44, %v742_v45 }
  0xf0   : > { %v826_v37 = vadd.f32 %v825_v34, %v782_v33 }
  0xf2   : > { %v873_v43 = vadd.f32 %v872_v38, %v826_v37 }
  0xf4   : > { %v910_v46 = vadd.f32 %v909_v41, %v873_v43 }
  0xf6   : > { %921 = vst [vmem:[%s1478_s28 + $0x18] sm:$0x3f] %v910_v46  ;;  %v913_v51 = vpop.f32.mrf.mxu3 }
  0xf7   : > { %v831_v28 = vpop.f32.mrf.mxu1  ;;  %v876_v50 = vpop.f32.mrf.mxu2 }
  0xf8   : > { %v832_v49 = vadd.f32 %v831_v28, %v787_v48 }
  0xfa   : > { %v877_v52 = vadd.f32 %v876_v50, %v832_v49 }
  0xfc   : > { %v914_v54 = vadd.f32 %v913_v51, %v877_v52 }
  0xfe   : > { %v924_v55 = vrot.slane %v914_v54, 4 }
 0x100   : > { %v926_v39 = vsel %vm925_vm1, %v636_v35, %v924_v55 }
 0x101   : > { %928 = vst [vmem:[%s309_s7] sm:$0xff] %v926_v39 }
 0x102 PF: > { %s16_s20 = sadd.s32 1, %s1184_s20   ;;  %s1510_s18 = smov %s1180_s19 }
 0x103   : > { %p13_p5 = scmp.ge.s32.totalorder %s16_s20, 4   ;;  %s1511_s19 = smov %s1513_s21 }
 0x105   :  { %15 = sbr.rel (!%p13_p5) target bundleno = 2 (0x2), region = 86 }

</bundles_post_ra>
